<compile_context>
chip_gen: v5e
topology: v5e:2x2
jax: 0.10.0
libtpu: 0.0.40
codegen_flags: <defaults>
</compile_context>

<pallas_src>
import jax
import jax.numpy as jnp
from jax.experimental import pallas as pl
from jax.experimental.pallas import tpu as pltpu


# ----------------------------------------------------------------------------
# Kernel
# ----------------------------------------------------------------------------
def mobilevit_v2_attn_kernel(
    x_ref,      # (Bt, N, Dp)            input tile (Dp = d_model padded to 128)
    wkvi_ref,   # (Dp, 2*Dp + 128)       fused [fc_k | fc_v | fc_i(pad 128)] weight
    bkv_ref,    # (1, 2*Dp + 128)        fused [bk | bv | 0] bias, f32
    wo_ref,     # (Dp, Dp)               fc_o weight
    bo_ref,     # (1, Dp)                fc_o bias, f32
    o_ref,      # (Bt, N, Dp)
):
    bt, n, dp = x_ref.shape

    # Flatten batches -> one tall lane-dense MXU operand.  Cast to the weight
    # dtype (bf16 in mixed-precision mode); accumulation is always f32.
    x2 = x_ref[...].reshape(bt * n, dp).astype(wkvi_ref.dtype)

    # Fused [fc_k | fc_v | fc_i] projection: a single (Bt*N, Dp)@(Dp, 2Dp+128)
    # matmul.  All column slices below are 128-aligned (Dp is a multiple of 128).
    kvl = jnp.dot(x2, wkvi_ref[...], preferred_element_type=jnp.float32) + bkv_ref[...]

    k3 = kvl[:, :dp].reshape(bt, n, dp)            # fc_k(x), f32
    v3 = kvl[:, dp:2 * dp].reshape(bt, n, dp)      # fc_v(x), f32
    # fc_i logits live in lane 0 of the trailing 128-lane padded block.
    logits = kvl[:, 2 * dp:2 * dp + 1].reshape(bt, n, 1)   # (Bt, N, 1) f32

    # Softmax over the sequence (sublane) axis.  fc_i bias is dropped: softmax
    # is invariant to a per-batch scalar shift of the logits.
    m = jnp.max(logits, axis=1, keepdims=True)
    e = jnp.exp(logits - m)
    denom = jnp.sum(e, axis=1, keepdims=True)
    w = e * pl.reciprocal(denom, approx=True)      # (Bt, N, 1)  (~1e-3 rel err from approx)

    # context_vector = sum_n softmax(i)_n * k_n  -> (Bt, 1, Dp).
    # VPU broadcast-multiply + sublane (XLU) reduction; keeps the MXU free for
    # the two dominant projections.
    ctx = jnp.sum(w * k3, axis=1, keepdims=True)

    # v = fc_v(x) * context ;  out = fc_o(v) as one lane-dense (Bt*N,Dp)@(Dp,Dp).
    v_scaled = (v3 * ctx).reshape(bt * n, dp).astype(wo_ref.dtype)
    out = jnp.dot(v_scaled, wo_ref[...], preferred_element_type=jnp.float32) + bo_ref[...]

    o_ref[...] = out.reshape(bt, n, dp).astype(o_ref.dtype)


# ----------------------------------------------------------------------------
# Sizing helpers
# ----------------------------------------------------------------------------
def _round_up(v, m):
    return (v + m - 1) // m * m


def _vmem_budget_bytes():
    """Generation-aware scoped-VMEM budget."""
    mib = 1024 * 1024
    cap = 128 * mib
    try:  # hardware probe only; failure falls back to a 128 MiB-class default
        cap = int(pltpu.get_tpu_info().vmem_capacity_bytes)
    except Exception:
        pass
    if cap <= 64 * mib:
        # v7x-class: 64 MiB per TC -- leave headroom for internal scratch.
        return max(min(cap - 12 * mib, 52 * mib), 32 * mib)
    # v5e / v6e: 128 MiB physical -- allow large tiles, keep some headroom.
    return max(min(cap - 28 * mib, 100 * mib), 64 * mib)


def _select_bt(B, N, Dp, io_itemsize, weight_bytes, budget, requested):
    """Pick the batch tile: fill the MXU (>=~512 rows), fit VMEM, keep grid>=2."""
    per_b = (4 * N * Dp * io_itemsize        # x + out blocks, double-buffered
             + N * (2 * Dp + 128) * 4        # fused kvl intermediate (f32)
             + 3 * N * Dp * 4)               # k/v working set, v_scaled, pre-cast out (f32)
    per_b = int(per_b * 1.25) + 4096
    avail = max(budget - 2 * weight_bytes, per_b)
    bt_cap = max(1, avail // per_b)
    bt_target = requested if requested is not None else max(1, -(-512 // max(N, 1)))
    bt = int(min(bt_target, bt_cap, B))
    if B >= 2:
        # Guarantee >= 2 grid steps: megacore sharding (v7x) + pipeline overlap.
        bt = min(bt, (B + 1) // 2)
    return max(int(bt), 1)


_BUFFERED1_SUPPORTED = None


def _buffered1_supported():
    """Feature-detect pipeline_mode=pl.Buffered(1) ONCE with a tiny probe kernel.

    The real kernel is never wrapped in a broad try/except; only this isolated
    probe may swallow an exception.
    """
    global _BUFFERED1_SUPPORTED
    if _BUFFERED1_SUPPORTED is None:
        try:
            def _probe(x_ref, o_ref):
                o_ref[...] = x_ref[...]

            out = pl.pallas_call(
                _probe,
                out_shape=jax.ShapeDtypeStruct((8, 128), jnp.float32),
                grid=(1,),
                in_specs=[pl.BlockSpec((8, 128), lambda i: (0, 0),
                                       pipeline_mode=pl.Buffered(1))],
                out_specs=pl.BlockSpec((8, 128), lambda i: (0, 0)),
            )(jnp.zeros((8, 128), jnp.float32))
            jax.block_until_ready(out)
            _BUFFERED1_SUPPORTED = True
        except Exception:
            _BUFFERED1_SUPPORTED = False
    return _BUFFERED1_SUPPORTED


# ----------------------------------------------------------------------------
# Wrapper
# ----------------------------------------------------------------------------
def mobilevit_v2_attention(x, params, *, batch_tile=None, prefer_bf16_matmul=False,
                           single_buffer_weights=True):
    """x: (B, N, D). params: dict of transposed (in, out) weights / (1, out) biases."""
    B, N, D = x.shape
    Dp = max(_round_up(D, 128), 128)

    # MXU operand dtype: bf16 when the input is bf16 or explicitly requested
    # (f32 accumulation in-kernel either way).
    mm_dtype = jnp.bfloat16 if (prefer_bf16_matmul or x.dtype == jnp.bfloat16) else x.dtype
    f32 = jnp.float32

    def pad2(w, rows, cols):
        r, c = w.shape
        return jnp.pad(w, ((0, rows - r), (0, cols - c)))

    # Fused, lane-padded weights: [fc_k | fc_v | fc_i(pad->128)] -> (Dp, 2Dp+128).
    wk = pad2(params["wk"].astype(mm_dtype), Dp, Dp)
    wv = pad2(params["wv"].astype(mm_dtype), Dp, Dp)
    wi = pad2(params["wi"].astype(mm_dtype).reshape(D, 1), Dp, 128)
    w_kvi = jnp.concatenate([wk, wv, wi], axis=1)
    bk = pad2(params["bk"].astype(f32).reshape(1, -1), 1, Dp)
    bv = pad2(params["bv"].astype(f32).reshape(1, -1), 1, Dp)
    b_kvi = jnp.concatenate([bk, bv, jnp.zeros((1, 128), f32)], axis=1)
    # NOTE: params["bi"] (fc_i bias) is intentionally NOT passed -- softmax over
    # the sequence is invariant to a scalar shift of the logits.
    wo = pad2(params["wo"].astype(mm_dtype), Dp, Dp)
    bo = pad2(params["bo"].astype(f32).reshape(1, -1), 1, Dp)

    io_itemsize = jnp.dtype(x.dtype).itemsize
    w_itemsize = jnp.dtype(mm_dtype).itemsize
    weight_bytes = (int(w_kvi.size) + int(wo.size)) * w_itemsize \
        + (int(b_kvi.size) + int(bo.size)) * 4

    budget = _vmem_budget_bytes()
    bt = _select_bt(B, N, Dp, io_itemsize, weight_bytes, budget, batch_tile)
    Bp = _round_up(B, bt)

    # Zero-pad batch (for divisibility) and lanes (D -> Dp); padding is exact
    # because the padded weight rows/cols are zero. Output is sliced back below.
    xp = x
    if Bp != B or Dp != D:
        xp = jnp.pad(x, ((0, Bp - B), (0, 0), (0, Dp - D)))

    flops = 2 * Bp * N * Dp * (3 * Dp + 128) + 4 * Bp * N * Dp
    bytes_accessed = 2 * Bp * N * Dp * io_itemsize + weight_bytes
    cost = pl.CostEstimate(flops=int(flops), transcendentals=int(Bp * N),
                           bytes_accessed=int(bytes_accessed))

    single_buf = bool(single_buffer_weights) and _buffered1_supported()
    wmode = {"pipeline_mode": pl.Buffered(1)} if single_buf else {}

    def const(shape):
        # Grid-invariant operand: constant index map; single-buffered if supported.
        return pl.BlockSpec(shape, lambda b, _s=len(shape): (0,) * _s, **wmode)

    grid_spec = pltpu.PrefetchScalarGridSpec(
        num_scalar_prefetch=0,
        grid=(Bp // bt,),
        in_specs=[
            pl.BlockSpec((bt, N, Dp), lambda b: (b, 0, 0)),   # x: Bt batches / step
            const((Dp, 2 * Dp + 128)),
            const((1, 2 * Dp + 128)),
            const((Dp, Dp)),
            const((1, Dp)),
        ],
        out_specs=pl.BlockSpec((bt, N, Dp), lambda b: (b, 0, 0)),
    )

    out = pl.pallas_call(
        mobilevit_v2_attn_kernel,
        out_shape=jax.ShapeDtypeStruct((Bp, N, Dp), x.dtype),
        grid_spec=grid_spec,
        compiler_params=pltpu.CompilerParams(
            dimension_semantics=("parallel",),
            vmem_limit_bytes=int(budget),
        ),
        cost_estimate=cost,
    )(xp, w_kvi, b_kvi, wo, bo)

    if Bp != B or Dp != D:
        out = out[:B, :, :D]
    return out


# ----------------------------------------------------------------------------
# Parameter init (matches PyTorch: Linear weights ~ N(0, 0.001^2), biases = 0)
# ----------------------------------------------------------------------------
def init_params(key, d_model, dtype=jnp.float32):
    k_i, k_k, k_v, k_o = jax.random.split(key, 4)
    std = 0.001
    return {
        "wi": (std * jax.random.normal(k_i, (d_model, 1), jnp.float32)).astype(dtype),
        "bi": jnp.zeros((1, 1), dtype),
        "wk": (std * jax.random.normal(k_k, (d_model, d_model), jnp.float32)).astype(dtype),
        "bk": jnp.zeros((1, d_model), dtype),
        "wv": (std * jax.random.normal(k_v, (d_model, d_model), jnp.float32)).astype(dtype),
        "bv": jnp.zeros((1, d_model), dtype),
        "wo": (std * jax.random.normal(k_o, (d_model, d_model), jnp.float32)).astype(dtype),
        "bo": jnp.zeros((1, d_model), dtype),
    }


def reference(x, p):
    """Pure-JAX reference mirroring the PyTorch forward."""
    i = x @ p["wi"] + p["bi"]                                       # (B, N, 1)
    weight_i = jax.nn.softmax(i, axis=1)                            # softmax over seq
    context_score = weight_i * (x @ p["wk"] + p["bk"])              # (B, N, D)
    context_vector = jnp.sum(context_score, axis=1, keepdims=True)  # (B, 1, D)
    v = (x @ p["wv"] + p["bv"]) * context_vector                    # (B, N, D)
    return v @ p["wo"] + p["bo"]                                    # (B, N, D)


if __name__ == "__main__":
    B, N, D = 8, 8, 32
    key = jax.random.PRNGKey(0)
    k_x, k_p = jax.random.split(key)
    x = jax.random.normal(k_x, (B, N, D), jnp.float32)
    params = init_params(k_p, D)

    # f32 run, checked against the pure-JAX reference (D=32 exercises the
    # lane-padding path: Dp = 128).
    out = jax.block_until_ready(mobilevit_v2_attention(x, params))
    assert out.shape == (B, N, D)
    ref = reference(x, params)
    rel_err = float(jnp.max(jnp.abs(out - ref)) / (jnp.max(jnp.abs(ref)) + 1e-30))
    assert rel_err < 1e-2, f"mismatch vs reference: rel_err={rel_err}"

    # bf16-storage run (halves HBM traffic / VMEM; f32 accumulation in-kernel).
    x_bf = x.astype(jnp.bfloat16)
    params_bf = {k: v.astype(jnp.bfloat16) for k, v in params.items()}
    out_bf = jax.block_until_ready(mobilevit_v2_attention(x_bf, params_bf))
    assert out_bf.shape == (B, N, D)
    assert bool(jnp.all(jnp.isfinite(out_bf.astype(jnp.float32))))

    # Non-divisible batch (exercises batch padding) + explicit bf16-MXU mode.
    x_odd = jax.random.normal(k_x, (5, N, D), jnp.float32)
    out_odd = jax.block_until_ready(
        mobilevit_v2_attention(x_odd, params, prefer_bf16_matmul=True))
    assert out_odd.shape == (5, N, D)
    ref_odd = reference(x_odd, params)
    rel_err_odd = float(jnp.max(jnp.abs(out_odd - ref_odd))
                        / (jnp.max(jnp.abs(ref_odd)) + 1e-30))
    assert rel_err_odd < 5e-2, f"bf16-matmul mismatch: rel_err={rel_err_odd}"

    print("KERNEL_OK")
</pallas_src>

<mosaic_0001>
module attributes {stable_mosaic.version = 11 : i64} {
  func.func @_probe(%arg0: i32, %arg1: memref<8x128xf32, #tpu.memory_space<vmem>>, %arg2: memref<8x128xf32, #tpu.memory_space<vmem>>) attributes {dimension_semantics = [#tpu.dimension_semantics<arbitrary>], iteration_bounds = array<i64: 1>, scalar_prefetch = 0 : i64, scratch_operands = 0 : i64, tpu.core_type = #tpu.core_type<tc>, window_params = [{pipeline_mode = #tpu.pipeline_mode<synchronous>, transform_indices = @transform_0, window_bounds = array<i64: 8, 128>}, {pipeline_mode = #tpu.pipeline_mode<synchronous>, transform_indices = @transform_1, window_bounds = array<i64: 8, 128>}]} {
    %c0 = arith.constant 0 : index
    %c0_0 = arith.constant 0 : index
    %0 = vector.load %arg1[%c0, %c0_0] : memref<8x128xf32, #tpu.memory_space<vmem>>, vector<8x128xf32>
    %c0_1 = arith.constant 0 : index
    %c0_2 = arith.constant 0 : index
    %1 = vector.load %arg2[%c0_1, %c0_2] : memref<8x128xf32, #tpu.memory_space<vmem>>, vector<8x128xf32>
    tpu.vector_store %arg2[%c0_1, %c0_2], %0 {strides = array<i32>} : memref<8x128xf32, #tpu.memory_space<vmem>>, vector<8x128xf32>,
    return
  }
  func.func @transform_0(%arg0: i32) -> (i32, i32) {
    %c0_i32 = arith.constant 0 : i32
    %c0_i32_0 = arith.constant 0 : i32
    %c0_i32_1 = arith.constant 0 : i32
    return %c0_i32, %c0_i32_0 : i32, i32
  }
  func.func @transform_1(%arg0: i32) -> (i32, i32) {
    %c0_i32 = arith.constant 0 : i32
    %c0_i32_0 = arith.constant 0 : i32
    %c0_i32_1 = arith.constant 0 : i32
    return %c0_i32, %c0_i32_0 : i32, i32
  }
}

module attributes {stable_mosaic.version = 11 : i64} {
  func.func @mobilevit_v2_attn_kernel(%arg0: i32, %arg1: memref<4x8x128xf32, #tpu.memory_space<vmem>>, %arg2: memref<128x384xf32, #tpu.memory_space<vmem>>, %arg3: memref<1x384xf32, #tpu.memory_space<vmem>>, %arg4: memref<128x128xf32, #tpu.memory_space<vmem>>, %arg5: memref<1x128xf32, #tpu.memory_space<vmem>>, %arg6: memref<4x8x128xf32, #tpu.memory_space<vmem>>) attributes {dimension_semantics = [#tpu.dimension_semantics<parallel>], iteration_bounds = array<i64: 2>, scalar_prefetch = 0 : i64, scratch_operands = 0 : i64, tpu.core_type = #tpu.core_type<tc>, window_params = [{transform_indices = @transform_0, window_bounds = array<i64: 4, 8, 128>}, {pipeline_mode = #tpu.pipeline_mode<synchronous>, transform_indices = @transform_1, window_bounds = array<i64: 128, 384>}, {pipeline_mode = #tpu.pipeline_mode<synchronous>, transform_indices = @transform_2, window_bounds = array<i64: 1, 384>}, {pipeline_mode = #tpu.pipeline_mode<synchronous>, transform_indices = @transform_3, window_bounds = array<i64: 128, 128>}, {pipeline_mode = #tpu.pipeline_mode<synchronous>, transform_indices = @transform_4, window_bounds = array<i64: 1, 128>}, {transform_indices = @transform_5, window_bounds = array<i64: 4, 8, 128>}]} {
    %c0 = arith.constant 0 : index
    %c0_0 = arith.constant 0 : index
    %c0_1 = arith.constant 0 : index
    %0 = vector.load %arg1[%c0, %c0_0, %c0_1] : memref<4x8x128xf32, #tpu.memory_space<vmem>>, vector<4x8x128xf32>
    %1 = vector.shape_cast %0 : vector<4x8x128xf32> to vector<32x128xf32>
    %c0_2 = arith.constant 0 : index
    %c0_3 = arith.constant 0 : index
    %2 = vector.load %arg2[%c0_2, %c0_3] : memref<128x384xf32, #tpu.memory_space<vmem>>, vector<128x384xf32>
    %cst = arith.constant dense<0.000000e+00> : vector<32x384xf32>
    %3 = tpu.matmul %1, %2, %cst {dimension_numbers = #tpu.dot_dimension_numbers<[1], [0], [0], [1], [0, 0, 1, 1], [], []>} : vector<32x128xf32>, vector<128x384xf32>, vector<32x384xf32> -> vector<32x384xf32>
    %c0_4 = arith.constant 0 : index
    %c0_5 = arith.constant 0 : index
    %4 = vector.load %arg3[%c0_4, %c0_5] : memref<1x384xf32, #tpu.memory_space<vmem>>, vector<1x384xf32>
    %5 = vector.broadcast %4 : vector<1x384xf32> to vector<32x384xf32>
    %6 = arith.addf %3, %5 : vector<32x384xf32>
    %7 = vector.extract_strided_slice %6 {offsets = [0, 0], sizes = [32, 128], strides = [1, 1]} : vector<32x384xf32> to vector<32x128xf32>
    %8 = vector.shape_cast %7 : vector<32x128xf32> to vector<4x8x128xf32>
    %9 = vector.extract_strided_slice %6 {offsets = [0, 128], sizes = [32, 128], strides = [1, 1]} : vector<32x384xf32> to vector<32x128xf32>
    %10 = vector.shape_cast %9 : vector<32x128xf32> to vector<4x8x128xf32>
    %11 = vector.extract_strided_slice %6 {offsets = [0, 256], sizes = [32, 1], strides = [1, 1]} : vector<32x384xf32> to vector<32x1xf32>
    %12 = vector.shape_cast %11 : vector<32x1xf32> to vector<4x8x1xf32>
    %cst_6 = arith.constant dense<0xFF800000> : vector<4x1xf32>
    %13 = vector.multi_reduction <maximumf>, %12, %cst_6 [1] : vector<4x8x1xf32> to vector<4x1xf32>
    %14 = vector.shape_cast %13 : vector<4x1xf32> to vector<4x1x1xf32>
    %15 = vector.broadcast %14 : vector<4x1x1xf32> to vector<4x8x1xf32>
    %16 = arith.subf %12, %15 : vector<4x8x1xf32>
    %17 = math.exp %16 : vector<4x8x1xf32>
    %cst_7 = arith.constant dense<0.000000e+00> : vector<4x1xf32>
    %18 = vector.multi_reduction <add>, %17, %cst_7 [1] : vector<4x8x1xf32> to vector<4x1xf32>
    %19 = vector.shape_cast %18 : vector<4x1xf32> to vector<4x1x1xf32>
    %20 = tpu.reciprocal %19 {approx = true} : vector<4x1x1xf32> -> vector<4x1x1xf32>
    %21 = vector.broadcast %20 : vector<4x1x1xf32> to vector<4x8x1xf32>
    %22 = arith.mulf %17, %21 : vector<4x8x1xf32>
    %23 = vector.broadcast %22 : vector<4x8x1xf32> to vector<4x8x128xf32>
    %24 = arith.mulf %23, %8 : vector<4x8x128xf32>
    %cst_8 = arith.constant dense<0.000000e+00> : vector<4x128xf32>
    %25 = vector.multi_reduction <add>, %24, %cst_8 [1] : vector<4x8x128xf32> to vector<4x128xf32>
    %26 = vector.shape_cast %25 : vector<4x128xf32> to vector<4x1x128xf32>
    %27 = vector.broadcast %26 : vector<4x1x128xf32> to vector<4x8x128xf32>
    %28 = arith.mulf %10, %27 : vector<4x8x128xf32>
    %29 = vector.shape_cast %28 : vector<4x8x128xf32> to vector<32x128xf32>
    %c0_9 = arith.constant 0 : index
    %c0_10 = arith.constant 0 : index
    %30 = vector.load %arg4[%c0_9, %c0_10] : memref<128x128xf32, #tpu.memory_space<vmem>>, vector<128x128xf32>
    %cst_11 = arith.constant dense<0.000000e+00> : vector<32x128xf32>
    %31 = tpu.matmul %29, %30, %cst_11 {dimension_numbers = #tpu.dot_dimension_numbers<[1], [0], [0], [1], [0, 0, 1, 1], [], []>} : vector<32x128xf32>, vector<128x128xf32>, vector<32x128xf32> -> vector<32x128xf32>
    %c0_12 = arith.constant 0 : index
    %c0_13 = arith.constant 0 : index
    %32 = vector.load %arg5[%c0_12, %c0_13] : memref<1x128xf32, #tpu.memory_space<vmem>>, vector<1x128xf32>
    %33 = vector.broadcast %32 : vector<1x128xf32> to vector<32x128xf32>
    %34 = arith.addf %31, %33 : vector<32x128xf32>
    %35 = vector.shape_cast %34 : vector<32x128xf32> to vector<4x8x128xf32>
    %c0_14 = arith.constant 0 : index
    %c0_15 = arith.constant 0 : index
    %c0_16 = arith.constant 0 : index
    %36 = vector.load %arg6[%c0_14, %c0_15, %c0_16] : memref<4x8x128xf32, #tpu.memory_space<vmem>>, vector<4x8x128xf32>
    tpu.vector_store %arg6[%c0_14, %c0_15, %c0_16], %35 {strides = array<i32>} : memref<4x8x128xf32, #tpu.memory_space<vmem>>, vector<4x8x128xf32>,
    return
  }
  func.func @transform_0(%arg0: i32) -> (i32, i32, i32) {
    %c0_i32 = arith.constant 0 : i32
    %c0_i32_0 = arith.constant 0 : i32
    %c0_i32_1 = arith.constant 0 : i32
    return %arg0, %c0_i32, %c0_i32_0 : i32, i32, i32
  }
  func.func @transform_1(%arg0: i32) -> (i32, i32) {
    %c0_i32 = arith.constant 0 : i32
    %c0_i32_0 = arith.constant 0 : i32
    %c0_i32_1 = arith.constant 0 : i32
    return %c0_i32, %c0_i32_0 : i32, i32
  }
  func.func @transform_2(%arg0: i32) -> (i32, i32) {
    %c0_i32 = arith.constant 0 : i32
    %c0_i32_0 = arith.constant 0 : i32
    %c0_i32_1 = arith.constant 0 : i32
    return %c0_i32, %c0_i32_0 : i32, i32
  }
  func.func @transform_3(%arg0: i32) -> (i32, i32) {
    %c0_i32 = arith.constant 0 : i32
    %c0_i32_0 = arith.constant 0 : i32
    %c0_i32_1 = arith.constant 0 : i32
    return %c0_i32, %c0_i32_0 : i32, i32
  }
  func.func @transform_4(%arg0: i32) -> (i32, i32) {
    %c0_i32 = arith.constant 0 : i32
    %c0_i32_0 = arith.constant 0 : i32
    %c0_i32_1 = arith.constant 0 : i32
    return %c0_i32, %c0_i32_0 : i32, i32
  }
  func.func @transform_5(%arg0: i32) -> (i32, i32, i32) {
    %c0_i32 = arith.constant 0 : i32
    %c0_i32_0 = arith.constant 0 : i32
    %c0_i32_1 = arith.constant 0 : i32
    return %arg0, %c0_i32, %c0_i32_0 : i32, i32, i32
  }
}

</mosaic_0001>

<bundles_post_ra>
// kernel: tpu_custom_call.1
= control target key start
LH: loop header
LB: loop body
LE: loop exit
PB: predicated region body
PF: predicated region fallthrough
CT: control target
= control target key end

     0   :  { %6 = vsyncpa [#allocation3], 0  ;;  %s114_s0 = inlined_call_operand.hbm [shape: f32[8,128], index: 0, kind: input, shape index: {}]   ;;  %s115_s1 = inlined_call_operand.hbm [shape: f32[8,128], index: 1, kind: output, shape index: {}]  }
   0x1   :  { %7 = vsyncpa [#allocation4], 0  ;;  %s13_s8 = sshll.u32 %s114_s0, 4  ;;  %s96_s9 = smov [#allocation2]   ;;  %s14_s8 = int_to_ptr.hbm [resolvable:$true] %s13_s8 }
   0x2   :  { %s15_s10 = sshll.u32 %s96_s9, 4  ;;  %s16_s10 = int_to_ptr.vmem [resolvable:$true] %s15_s10 }
   0x3   :  { %18 = dma.hbm_to_vmem [thread:$0]  %s14_s8, 128, %s16_s10, [#allocation3]  }
   0x4   :  { %92 = dma.done.wait [#allocation3], 128  }
   0x5   :  { %93 = vsyncadd [#allocation3], 4294967168  ;;  %s97_s11 = smov [#allocation5]   ;;  %s32_s15 = sshll.u32 %s115_s1, 4  ;;  %v23_v0 = vld [vmem:[#allocation2] sm:$0xff]  ;;  %s33_s15 = int_to_ptr.hbm [resolvable:$true] %s32_s15 }
   0x6   :  { %s30_s12 = sshll.u32 %s97_s11, 4  ;;  %24 = vst [vmem:[#allocation5] sm:$0xff] %v23_v0  ;;  %s31_s12 = int_to_ptr.vmem [resolvable:$true] %s30_s12 }
   0x7   :  { %35 = dma.vmem_to_hbm [thread:$0]  %s31_s12, 128, %s33_s15, [#allocation4]  }
   0x8   :  { %94 = dma.done.wait [#allocation4], 128  }
   0x9   :  { %95 = vsyncadd [#allocation4], 4294967168 }
   0xa   :  { %40 = vsyncpa [#allocation3], 1 }
   0xb   :  { %41 = vsyncpa [#allocation4], 1 }

// kernel: tpu_custom_call.1
= control target key start
LH: loop header
LB: loop body
LE: loop exit
PB: predicated region body
PF: predicated region fallthrough
CT: control target
= control target key end

     0   :  { %10 = vsyncpa [#allocation3], 0  ;;  %s1319_s0 = inlined_call_operand.hbm [shape: f32[8,8,128], index: 0, kind: input, shape index: {}]   ;;  %s1320_s1 = inlined_call_operand.hbm [shape: f32[128,384], index: 1, kind: input, shape index: {}]   ;;  %s1321_s2 = inlined_call_operand.hbm [shape: f32[1,384], index: 2, kind: input, shape index: {}]   ;;  %s1322_s3 = inlined_call_operand.hbm [shape: f32[128,128], index: 3, kind: input, shape index: {}]   ;;  %s1323_s4 = inlined_call_operand.vmem [shape: f32[1,128], index: 4, kind: input, shape index: {}]   ;;  %s1324_s5 = inlined_call_operand.hbm [shape: f32[8,8,128], index: 5, kind: output, shape index: {}]  }
   0x1   :  { %12 = vsyncpa [#allocation3 + $0x1], 0 }
   0x2   :  { %13 = vsyncpa [#allocation6], 0 }
   0x3   :  { %14 = vsyncpa [#allocation9], 0 }
   0x4   :  { %15 = vsyncpa [#allocation4], 0 }
   0x5   :  { %17 = vsyncpa [#allocation4 + $0x1], 0  ;;  %s1103_s18 = smov 0   ;;  %s1105_s19 = smov 0  }
   0x6   :  { %s1107_s20 = smov 0   ;;  %s1109_s21 = smov 0  }
   0x7 LB: > { %s1124_s22 = sadd.s32 4294967295, %s1061_s21   ;;  %s742_s23 = sadd.s32 4294967294, %s1061_s21   ;;  %s1061_s21 = sphi %s1109_s21, %s1337_s21   ;;  %s1057_s20 = sphi %s1107_s20, %s1336_s20   ;;  %s1053_s19 = sphi %s1105_s19, %s1335_s19   ;;  %s1049_s18 = sphi %s1103_s18, %s1334_s18  }
   0x8   : > { %p43_p0 = scmp.ne.s32.totalorder %s1053_s19, %s1049_s18  ;;  %p44_p1 = scmp.eq.s32.totalorder %s1124_s22, 0 }
   0x9   : > { %p151_p2 = scmp.eq.s32.totalorder %s1124_s22, 1  ;;  %p157_p3 = scmp.eq.s32.totalorder %s742_s23, 1 }
   0xa   : > { %p1133_p4 = por %p44_p1, %p43_p0  ;;  %p743_p5 = scmp.ge.s32.totalorder %s1061_s21, 1 }
   0xb   : > { %p1138_p6 = por %p157_p3, %p43_p0  ;;  %p164_p7 = scmp.lt.s32.totalorder %s1061_s21, 3 }
   0xc   : > { %s175_s28 = sshll.u32 %s1320_s1, 4  ;;  %s1063_s30 = smov [#allocation5]   ;;  %s176_s28 = int_to_ptr.hbm [resolvable:$true] %s175_s28 }
   0xd   : > { %p1146_p8 = pnand %p743_p5, %p164_p7  ;;  %s177_s6 = sshll.u32 %s1063_s30, 4  ;;  %s178_s6 = int_to_ptr.vmem [resolvable:$true] %s177_s6 }
   0xe   : > { %s190_s10 = sshll.u32 %s1321_s2, 4  ;;  %s1064_s11 = smov 384   ;;  %s191_s10 = int_to_ptr.hbm [resolvable:$true] %s190_s10 }
   0xf   : > { %p780_p9 = pneg %p1146_p8  ;;  %s1065_s12 = smov 24  }
  0x10   : > { %s1066_s13 = smov [#allocation7]   ;;  %s201_s17 = sshll.u32 %s1322_s3, 4  ;;  %s202_s17 = int_to_ptr.hbm [resolvable:$true] %s201_s17 }
  0x11   : > { %p1154_p10 = pnand %p780_p9, %p44_p1  ;;  %s192_s14 = sshll.u32 %s1066_s13, 4  ;;  %s193_s14 = int_to_ptr.vmem [resolvable:$true] %s192_s14 }
  0x12   : > { %s1067_s23 = smov [#allocation8]   ;;  %s1325_s27 = smov 128  }
  0x13   : > { %783 = dma.hbm_to_vmem [thread:$0]  (!%p1154_p10), %s176_s28, 6144, %s178_s6, [#allocation6], %s1064_s11, %s1064_s11, %s1065_s12  }
  0x14   : > { %786 = dma.hbm_to_vmem [thread:$0]  (!%p1154_p10), %s191_s10, 48, %s193_s14, [#allocation6]  }
  0x15   : > { %s203_s26 = sshll.u32 %s1067_s23, 4  ;;  %s1069_s28 = smov 8   ;;  %s204_s26 = int_to_ptr.vmem [resolvable:$true] %s203_s26 }
  0x16   : > { %789 = dma.hbm_to_vmem [thread:$0]  (!%p1154_p10), %s202_s17, 2048, %s204_s26, [#allocation9], %s1325_s27, %s1325_s27, %s1069_s28  }
  0x17   : > { %s1175_s30 = sadd.s32 1, %s1061_s21   ;;  %s30_s8 = sadd.s32 1, %s1057_s20 }
  0x18   : > { %s27_s6 = ssub.s32 %s1061_s21, %s1175_s30  ;;  %p37_p13 = scmp.ne.s32.totalorder %s1057_s20, %s1053_s19 }
  0x19   : > { %p28_p12 = scmp.eq.s32.totalorder %s27_s6, 0  ;;  %p38_p0 = scmp.eq.s32.totalorder %s1061_s21, 0 }
  0x1a   : > { %p1188_p3 = por %p151_p2, %p37_p13  ;;  %p801_p5 = scmp.lt.s32.totalorder %s1061_s21, 2 }
  0x1b   : > { %s1184_s9 = scalar_select %p28_p12, %s1057_s20, %s30_s8  }
  0x1c   : > { %s220_s7 = sand.u32 1, %s1057_s20   ;;  %s762_s11 = sshll.u32 %s1061_s21, 5 }
  0x1d   : > { %p39_p7 = por %p38_p0, %p37_p13  ;;  %s748_s12 = sshll.u32 %s220_s7, 5 }
  0x1e   : > { %s229_s15 = scalar_lea.hbm %s1319_s0, %s762_s11  ;;  %s224_s17 = scalar_lea.vmem [#allocation2], %s748_s12 }
  0x1f   : > { %s230_s16 = sshll.u32 %s229_s15, 4  ;;  %s232_s23 = sshll.u32 %s224_s17, 4  ;;  %s231_s16 = int_to_ptr.hbm [resolvable:$true] %s230_s16  ;;  %s233_s23 = int_to_ptr.vmem [resolvable:$true] %s232_s23 }
  0x20   : > { %p1198_p9 = pnand %p801_p5, %p39_p7  ;;  %s221_s6 = scalar_lea.sflag [#allocation3], %s220_s7 }
  0x21   : > { %s957_s8 = sshra.s32 %s231_s16, 4  ;;  %s964_s12 = scalar_lea.hbm %s1319_s0, 64  ;;  %s958_s8 = int_to_ptr.hbm [resolvable:$true] %s957_s8 }
  0x22   : > { %s959_s27 = scalar_lea.hbm %s958_s8, 32  ;;  %p961_p10 = pneg %p1198_p9 }
  0x23   : > { %p960_p2 = scmp.ne.s32.totalorder %s958_s8, %s959_s27  ;;  %p965_p0 = scmp.lt.s32.totalorder %s958_s8, %s1319_s0 }
  0x24   : > { %p966_p5 = scmp.lt.s32.totalorder %s964_s12, %s959_s27 }
  0x25   : > { %p962_p12 = pnand %p961_p10, %p960_p2 }
  0x26   : > { %p967_p7 = por %p966_p5, %p965_p0 }
  0x27   : > { %p963_p13 = pneg %p962_p12 }
  0x29   : > { %p968_p11 = pnand %p967_p7, %p963_p13 }
  0x2b   : > { %971 = shalt.err (!%p968_p11)
}
  0x2c   : > { %s1332_s7 = smov 128   ;;  %244 = sbr.rel (%p1146_p8) target bundleno = 559 (0x22f), region = 40 }
  0x2d   : > { %793 = dma.hbm_to_vmem [thread:$0]  (!%p1198_p9), %s231_s16, 512, %s233_s23, %s221_s6, %s1332_s7, %s1332_s7, %s1069_s28  }
  0x2e   : > { %s1218_s17 = sand.u32 (!%p1146_p8), 1, %s1053_s19  }
  0x2f   : > { %s752_s27 = sshll.u32 (!%p1146_p8), %s1218_s17, 5  ;;  %s247_s8 = scalar_lea.sflag (!%p1146_p8), [#allocation3], %s1218_s17 }
  0x30   : > { %s1224_s11 = scalar_lea.vmem (!%p1146_p8), [#allocation2], %s752_s27 }
  0x31   : > { %1032 = dma.done.wait (%p1133_p4), %s247_s8, 512  }
  0x32   : > { %1034 = vsyncadd (%p1133_p4), %s247_s8, 4294966784 }
  0x33   : > { %1036 = dma.done.wait (%p44_p1), [#allocation6], 6192  }
  0x34   : > { %1038 = vsyncadd (%p44_p1), [#allocation6], 4294961104 }
  0x35   : > { %1040 = dma.done.wait (%p44_p1), [#allocation9], 2048  }
  0x36   : > { %1042 = vsyncadd (%p44_p1), [#allocation9], 4294965248  ;;  %v346_v0 = vld [vmem:[#allocation5 + $0x178] sm:$0xff]  ;;  %v343_v1 = vld [vmem:[#allocation5 + $0x160] sm:$0xff]  ;;  %vm442_vm0 = vcmask 7168   ;;  %s292_s28 = scalar_lea.vmem [#allocation10], %s752_s27 }
  0x37   : > { %413 = vmatpush.msra.mxu2 %v346_v0  ;;  %v340_v2 = vld [vmem:[#allocation5 + $0x148] sm:$0xff]  ;;  %v337_v3 = vld [vmem:[#allocation5 + $0x130] sm:$0xff]  ;;  %v334_v4 = vld [vmem:[#allocation5 + $0x118] sm:$0xff]  ;;  %s763_s16 = sshll.u32 %s1124_s22, 5  ;;  %s637_s13 = sshll.u32 %s292_s28, 4  ;;  %s638_s13 = int_to_ptr.vmem [resolvable:$true] %s637_s13 }
  0x38   : > { %v331_v5 = vld [vmem:[#allocation5 + $0x100] sm:$0xff]  ;;  %v328_v6 = vld [vmem:[#allocation5 + $0xe8] sm:$0xff]  ;;  %v325_v7 = vld [vmem:[#allocation5 + $0xd0] sm:$0xff]  ;;  %s636_s6 = scalar_lea.hbm %s1324_s5, %s763_s16  ;;  %s625_s14 = scalar_lea.sflag [#allocation4], %s1218_s17 }
  0x39   : > { %414 = vmatpush.msra.mxu2 %v343_v1  ;;  %v322_v8 = vld [vmem:[#allocation5 + $0xb8] sm:$0xff]  ;;  %v319_v9 = vld [vmem:[#allocation5 + $0xa0] sm:$0xff]  ;;  %v316_v10 = vld [vmem:[#allocation5 + $0x88] sm:$0xff]  ;;  %s639_s12 = sshll.u32 %s636_s6, 4  ;;  %s1007_s8 = scalar_lea.hbm %s1324_s5, 64  ;;  %s640_s12 = int_to_ptr.hbm [resolvable:$true] %s639_s12 }
  0x3a   : > { %v313_v11 = vld [vmem:[#allocation5 + $0x70] sm:$0xff]  ;;  %v310_v12 = vld [vmem:[#allocation5 + $0x58] sm:$0xff]  ;;  %v307_v13 = vld [vmem:[#allocation5 + $0x40] sm:$0xff]  ;;  %s1001_s15 = sshra.s32 %s640_s12, 4  ;;  %s1002_s15 = int_to_ptr.hbm [resolvable:$true] %s1001_s15 }
  0x3b   : > { %415 = vmatpush.msra.mxu2 %v340_v2  ;;  %v304_v14 = vld [vmem:[#allocation5 + $0x28] sm:$0xff]  ;;  %v301_v15 = vld [vmem:[#allocation5 + $0x10] sm:$0xff]  ;;  %v1239_v16 = vld [vmem:[%s1224_s11] sm:$0xff]  ;;  %s1003_s7 = scalar_lea.hbm %s1002_s15, 32  ;;  %p1008_p11 = scmp.lt.s32.totalorder %s1002_s15, %s1324_s5 }
  0x3c   : > { %v1243_v17 = vld [vmem:[%s1224_s11 + $0x8] sm:$0xff]  ;;  %v1247_v18 = vld [vmem:[%s1224_s11 + $0x10] sm:$0xff]  ;;  %v1251_v19 = vld [vmem:[%s1224_s11 + $0x18] sm:$0xff]  ;;  %p1004_p1 = scmp.ne.s32.totalorder %s1002_s15, %s1003_s7  ;;  %p1009_p9 = scmp.lt.s32.totalorder %s1007_s8, %s1003_s7 }
  0x3d   : > { %416 = vmatpush.msra.mxu2 %v337_v3  ;;  %v344_v20 = vld [vmem:[#allocation5 + $0x168] sm:$0xff]  ;;  %v341_v21 = vld [vmem:[#allocation5 + $0x150] sm:$0xff]  ;;  %v338_v22 = vld [vmem:[#allocation5 + $0x138] sm:$0xff] }
  0x3e   : > { %355 = vmatpush.msra.mxu0 %v344_v20  ;;  %v335_v23 = vld [vmem:[#allocation5 + $0x120] sm:$0xff]  ;;  %v332_v24 = vld [vmem:[#allocation5 + $0x108] sm:$0xff]  ;;  %v329_v25 = vld [vmem:[#allocation5 + $0xf0] sm:$0xff]  ;;  %p1005_p4 = pnand %p1004_p1, %p1188_p3  ;;  %p1010_p2 = por %p1009_p9, %p1008_p11 }
  0x3f   : > { %417 = vmatpush.msra.mxu2 %v334_v4  ;;  %v326_v26 = vld [vmem:[#allocation5 + $0xd8] sm:$0xff]  ;;  %v323_v27 = vld [vmem:[#allocation5 + $0xc0] sm:$0xff]  ;;  %v345_v28 = vld [vmem:[#allocation5 + $0x170] sm:$0xff] }
  0x40   : > { %356 = vmatpush.msra.mxu0 %v341_v21  ;;  %384 = vmatpush.msra.mxu1 %v345_v28  ;;  %v320_v29 = vld [vmem:[#allocation5 + $0xa8] sm:$0xff]  ;;  %v342_v30 = vld [vmem:[#allocation5 + $0x158] sm:$0xff]  ;;  %v317_v31 = vld [vmem:[#allocation5 + $0x90] sm:$0xff]  ;;  %p1006_p8 = pneg %p1005_p4 }
  0x41   : > { %418 = vmatpush.msra.mxu2 %v331_v5  ;;  %v339_v32 = vld [vmem:[#allocation5 + $0x140] sm:$0xff]  ;;  %v314_v33 = vld [vmem:[#allocation5 + $0x78] sm:$0xff]  ;;  %v336_v34 = vld [vmem:[#allocation5 + $0x128] sm:$0xff] }
  0x42   : > { %357 = vmatpush.msra.mxu0 %v338_v22  ;;  %385 = vmatpush.msra.mxu1 %v342_v30  ;;  %v1254_v35 = vld [vmem:[#allocation7] sm:$0x7]  ;;  %v333_v37 = vld [vmem:[#allocation5 + $0x110] sm:$0xff]  ;;  %v308_v38 = vld [vmem:[#allocation5 + $0x48] sm:$0xff]  ;;  %p1011_p10 = pnand %p1010_p2, %p1006_p8 }
  0x43   : > { %419 = vmatpush.msra.mxu2 %v328_v6  ;;  %v311_v36 = vld [vmem:[#allocation5 + $0x60] sm:$0xff]  ;;  %v330_v39 = vld [vmem:[#allocation5 + $0xf8] sm:$0xff]  ;;  %v1257_v40 = vperm.slane %v1254_v35, 2  ;;  %v305_v41 = vld [vmem:[#allocation5 + $0x30] sm:$0xff]  ;;  %v1070_v6 = vmov 0  }
  0x44   : > { %358 = vmatpush.msra.mxu0 %v335_v23  ;;  %386 = vmatpush.msra.mxu1 %v339_v32  ;;  %v327_v42 = vld [vmem:[#allocation5 + $0xe0] sm:$0xff]  ;;  %v302_v44 = vld [vmem:[#allocation5 + $0x18] sm:$0xff]  ;;  %v324_v45 = vld [vmem:[#allocation5 + $0xc8] sm:$0xff] }
  0x45   : > { %420 = vmatpush.msra.mxu2 %v325_v7  ;;  %v299_v47 = vld [vmem:[#allocation5] sm:$0xff]  ;;  %v321_v48 = vld [vmem:[#allocation5 + $0xb0] sm:$0xff]  ;;  %v318_v51 = vld [vmem:[#allocation5 + $0x98] sm:$0xff]  ;;  %848 = vset.pattern.permute.xlu0 %v1070_v6 }
  0x46   : > { %359 = vmatpush.msra.mxu0 %v332_v24  ;;  %387 = vmatpush.msra.mxu1 %v336_v34  ;;  %v315_v53 = vld [vmem:[#allocation5 + $0x80] sm:$0xff]  ;;  %v312_v56 = vld [vmem:[#allocation5 + $0x68] sm:$0xff]  ;;  %v309_v59 = vld [vmem:[#allocation5 + $0x50] sm:$0xff] }
  0x47   : > { %421 = vmatpush.msra.mxu2 %v322_v8  ;;  %v306_v63 = vld [vmem:[#allocation5 + $0x38] sm:$0xff]  ;;  %v303_v2 = vld [vmem:[#allocation5 + $0x20] sm:$0xff]  ;;  %v300_v7 = vld [vmem:[#allocation5 + $0x8] sm:$0xff]  ;;  %849 = vset.pattern.permute.xlu1 %v1070_v6 }
  0x48   : > { %360 = vmatpush.msra.mxu0 %v329_v25  ;;  %388 = vmatpush.msra.mxu1 %v333_v37 }
  0x49   : > { %422 = vmatpush.msra.mxu2 %v319_v9 }
  0x4a   : > { %361 = vmatpush.msra.mxu0 %v326_v26  ;;  %389 = vmatpush.msra.mxu1 %v330_v39 }
  0x4b   : > { %423 = vmatpush.msra.mxu2 %v316_v10 }
  0x4c   : > { %362 = vmatpush.msra.mxu0 %v323_v27  ;;  %390 = vmatpush.msra.mxu1 %v327_v42 }
  0x4d   : > { %424 = vmatpush.msra.mxu2 %v313_v11 }
  0x4e   : > { %363 = vmatpush.msra.mxu0 %v320_v29  ;;  %391 = vmatpush.msra.mxu1 %v324_v45 }
  0x4f   : > { %425 = vmatpush.msra.mxu2 %v310_v12 }
  0x50   : > { %364 = vmatpush.msra.mxu0 %v317_v31  ;;  %392 = vmatpush.msra.mxu1 %v321_v48 }
  0x51   : > { %426 = vmatpush.msra.mxu2 %v307_v13 }
  0x52   : > { %365 = vmatpush.msra.mxu0 %v314_v33  ;;  %393 = vmatpush.msra.mxu1 %v318_v51  ;;  %v585_v51 = vld [vmem:[#allocation8 + $0x70] sm:$0xff] }
  0x53   : > { %427 = vmatpush.msra.mxu2 %v304_v14 }
  0x54   : > { %366 = vmatpush.msra.mxu0 %v311_v36  ;;  %394 = vmatpush.msra.mxu1 %v315_v53 }
  0x55   : > { %428 = vmatpush.msra.mxu2 %v301_v15 }
  0x56   : > { %429 = vmatmul.f32.vlgmr.msra.gmra.mxu2 %v1239_v16  ;;  %367 = vmatpush.msra.mxu0 %v308_v38 }
  0x57   : > { %395 = vmatpush.msra.mxu1 %v312_v56 }
  0x58   : > { %368 = vmatpush.msra.mxu0 %v305_v41 }
  0x59   : > { %396 = vmatpush.msra.mxu1 %v309_v59 }
  0x5a   : > { %369 = vmatpush.msra.mxu0 %v302_v44 }
  0x5b   : > { %397 = vmatpush.msra.mxu1 %v306_v63  ;;  %v582_v63 = vld [vmem:[#allocation8 + $0x58] sm:$0xff] }
  0x5c   : > { %370 = vmatpush.msra.mxu0 %v299_v47 }
  0x5d   : > { %371 = vmatmul.f32.vlgmr.msra.gmra.mxu0 %v1239_v16  ;;  %398 = vmatpush.msra.mxu1 %v303_v2 }
  0x5e   : > { %432 = vmatmul.f32.gmra.mxu2 %v1243_v17 }
  0x5f   : > { %399 = vmatpush.msra.mxu1 %v300_v7 }
  0x60   : > { %400 = vmatmul.f32.vlgmr.msra.gmra.mxu1 %v1239_v16 }
  0x65   : > { %374 = vmatmul.f32.gmra.mxu0 %v1243_v17 }
  0x66   : > { %435 = vmatmul.f32.gmra.mxu2 %v1247_v18 }
  0x68   : > { %403 = vmatmul.f32.gmra.mxu1 %v1243_v17 }
  0x6d   : > { %377 = vmatmul.f32.gmra.mxu0 %v1247_v18 }
  0x6e   : > { %438 = vmatmul.f32.gmra.mxu2 %v1251_v19 }
  0x70   : > { %406 = vmatmul.f32.gmra.mxu1 %v1247_v18 }
  0x75   : > { %380 = vmatmul.f32.gmra.mxu0 %v1251_v19 }
  0x78   : > { %409 = vmatmul.f32.gmra.mxu1 %v1251_v19  ;;  %v581_v19 = vld [vmem:[#allocation8 + $0x50] sm:$0xff] }
  0xd9   : > { %v430_v43 = vpop.f32.mrf.mxu2 }
  0xda   : > { %v431_v46 = vadd.f32 %v430_v43, %v1257_v40 }
  0xdc   : > { %v443_v49 = vsel %vm442_vm0, %v431_v46, -inf }
  0xdd   : > { %v444_v50 = vrot.slane %v443_v49, 4 }
  0xdf   : > { %v445_v52 = vmax.f32 %v443_v49, %v444_v50  ;;  %v586_v50 = vld [vmem:[#allocation8 + $0x78] sm:$0xff] }
  0xe0   : > { %591 = vmatpush.msra.mxu3 %v586_v50 }
  0xe1   : > { %v446_v54 = vrot.slane %v445_v52, 2  ;;  %v433_v55 = vpop.f32.mrf.mxu2 }
  0xe2   : > { %v434_v57 = vadd.f32 %v433_v55, %v1257_v40  ;;  %v584_v55 = vld [vmem:[#allocation8 + $0x68] sm:$0xff]  ;;  %592 = vmatpush.msra.mxu3 %v585_v51 }
  0xe3   : > { %v447_v58 = vmax.f32 %v445_v52, %v446_v54 }
  0xe4   : > { %v450_v60 = vsel %vm442_vm0, %v434_v57, -inf  ;;  %593 = vmatpush.msra.mxu3 %v584_v55 }
  0xe5   : > { %v448_v61 = vrot.slane %v447_v58, 1  ;;  %v451_v62 = vrot.slane %v450_v60, 4 }
  0xe7   : > { %v449_v0 = vmax.f32 %v447_v58, %v448_v61  ;;  %v452_v1 = vmax.f32 %v450_v60, %v451_v62  ;;  %v583_v58 = vld [vmem:[#allocation8 + $0x60] sm:$0xff] }
  0xe8   : > { %594 = vmatpush.msra.mxu3 %v583_v58 }
  0xe9   : > { %v471_v3 = vsub.f32 %v431_v46, %v449_v0  ;;  %v453_v4 = vrot.slane %v452_v1, 2  ;;  %v436_v5 = vpop.f32.mrf.mxu2 }
  0xea   : > { %v437_v8 = vadd.f32 %v436_v5, %v1257_v40  ;;  %595 = vmatpush.msra.mxu3 %v582_v63 }
  0xeb   : > { %v475_v9 = vmul.f32 1.442695, %v471_v3  ;;  %v454_v10 = vmax.f32 %v452_v1, %v453_v4 }
  0xec   : > { %v457_v11 = vsel %vm442_vm0, %v437_v8, -inf  ;;  %596 = vmatpush.msra.mxu3 %v581_v19 }
  0xed   : > { %851 = vpow2.f32 %v475_v9  ;;  %v455_v12 = vrot.slane %v454_v10, 1  ;;  %v458_v13 = vrot.slane %v457_v11, 4 }
  0xef   : > { %v456_v14 = vmax.f32 %v454_v10, %v455_v12  ;;  %v459_v15 = vmax.f32 %v457_v11, %v458_v13 }
  0xf1   : > { %v472_v20 = vsub.f32 %v434_v57, %v456_v14  ;;  %v460_v21 = vrot.slane %v459_v15, 2  ;;  %v439_v22 = vpop.f32.mrf.mxu2 }
  0xf2   : > { %v440_v23 = vadd.f32 %v439_v22, %v1257_v40  ;;  %v580_v22 = vld [vmem:[#allocation8 + $0x48] sm:$0xff] }
  0xf3   : > { %v852_v24 = vpop.eup %851  ;;  %v477_v25 = vmul.f32 1.442695, %v472_v20  ;;  %v461_v26 = vmax.f32 %v459_v15, %v460_v21  ;;  %597 = vmatpush.msra.mxu3 %v580_v22  ;;  %v850_v22 = vld [vmem:[%s1323_s4] ss:$0 sm:$0xff] }
  0xf4   : > { %v483_v16 = vsel %vm442_vm0, %v852_v24, 0.0  ;;  %v464_v27 = vsel %vm442_vm0, %v440_v23, -inf }
  0xf5   : > { %v484_v28 = vrot.slane %v483_v16, 4  ;;  %853 = vpow2.f32 %v477_v25  ;;  %v462_v29 = vrot.slane %v461_v26, 1  ;;  %v465_v30 = vrot.slane %v464_v27, 4  ;;  %v577_v25 = vld [vmem:[#allocation8 + $0x30] sm:$0xff] }
  0xf7   : > { %v485_v31 = vadd.f32 %v484_v28, %v483_v16  ;;  %v463_v32 = vmax.f32 %v461_v26, %v462_v29  ;;  %v466_v33 = vmax.f32 %v464_v27, %v465_v30  ;;  %v576_v26 = vld [vmem:[#allocation8 + $0x28] sm:$0xff]  ;;  %v575_v16 = vld [vmem:[#allocation8 + $0x20] sm:$0xff]  ;;  %v574_v27 = vld [vmem:[#allocation8 + $0x18] sm:$0xff] }
  0xf8   : > { %v573_v28 = vld [vmem:[#allocation8 + $0x10] sm:$0xff]  ;;  %v572_v29 = vld [vmem:[#allocation8 + $0x8] sm:$0xff]  ;;  %v571_v30 = vld [vmem:[#allocation8] sm:$0xff] }
  0xf9   : > { %v473_v34 = vsub.f32 %v437_v8, %v463_v32  ;;  %v467_v36 = vrot.slane %v466_v33, 2  ;;  %v486_v37 = vrot.slane %v485_v31, 2  ;;  %v349_v32 = vperm.slane %v1254_v35, 0 }
  0xfb   : > { %v854_v38 = vpop.eup %853  ;;  %v479_v39 = vmul.f32 1.442695, %v473_v34  ;;  %v468_v40 = vmax.f32 %v466_v33, %v467_v36  ;;  %v487_v17 = vadd.f32 %v486_v37, %v485_v31  ;;  %v372_v31 = vpop.f32.mrf.mxu0 }
  0xfc   : > { %v490_v41 = vsel %vm442_vm0, %v854_v38, 0.0  ;;  %v373_v33 = vadd.f32 %v372_v31, %v349_v32 }
  0xfd   : > { %v491_v42 = vrot.slane %v490_v41, 4  ;;  %855 = vpow2.f32 %v479_v39  ;;  %v469_v43 = vrot.slane %v468_v40, 1  ;;  %v488_v44 = vrot.slane %v487_v17, 1 }
  0xff   : > { %v492_v45 = vadd.f32 %v491_v42, %v490_v41  ;;  %v470_v46 = vmax.f32 %v468_v40, %v469_v43  ;;  %v489_v47 = vadd.f32 %v488_v44, %v487_v17  ;;  %v350_v42 = vperm.slane %v1254_v35, 1 }
 0x101   : > { %v493_v48 = vrot.slane %v492_v45, 2  ;;  %v474_v49 = vsub.f32 %v440_v23, %v470_v46  ;;  %857 = vrcp.f32 %v489_v47  ;;  %v579_v23 = vld [vmem:[#allocation8 + $0x40] sm:$0xff] }
 0x102   : > { %598 = vmatpush.msra.mxu3 %v579_v23 }
 0x103   : > { %v856_v52 = vpop.eup %855  ;;  %v481_v53 = vmul.f32 1.442695, %v474_v49  ;;  %v494_v54 = vadd.f32 %v493_v48, %v492_v45  ;;  %v375_v34 = vpop.f32.mrf.mxu0 }
 0x104   : > { %v497_v18 = vsel %vm442_vm0, %v856_v52, 0.0  ;;  %v376_v17 = vadd.f32 %v375_v34, %v349_v32 }
 0x105   : > { %v498_v56 = vrot.slane %v497_v18, 4  ;;  %859 = vpow2.f32 %v481_v53  ;;  %v495_v57 = vrot.slane %v494_v54, 1 }
 0x107   : > { %v858_v59 = vpop.eup %857  ;;  %v499_v60 = vadd.f32 %v498_v56, %v497_v18  ;;  %v496_v61 = vadd.f32 %v495_v57, %v494_v54 }
 0x108   : > { %v515_v62 = vmul.f32 %v858_v59, %v852_v24  ;;  %v578_v24 = vld [vmem:[#allocation8 + $0x38] sm:$0xff] }
 0x109   : > { %861 = vrcp.f32 %v496_v61  ;;  %v500_v0 = vrot.slane %v499_v60, 2  ;;  %599 = vmatpush.msra.mxu3 %v578_v24 }
 0x10a   : > { %521 = vperm.xlu0 %848, %v515_v62  }
 0x10b   : > { %v860_v1 = vpop.eup %859  ;;  %v501_v2 = vadd.f32 %v500_v0, %v499_v60  ;;  %600 = vmatpush.msra.mxu3 %v577_v25  ;;  %v378_v44 = vpop.f32.mrf.mxu0 }
 0x10c   : > { %v504_v3 = vsel %vm442_vm0, %v860_v1, 0.0 }
 0x10d   : > { %v505_v4 = vrot.slane %v504_v3, 4  ;;  %v502_v5 = vrot.slane %v501_v2, 1  ;;  %601 = vmatpush.msra.mxu3 %v576_v26 }
 0x10f   : > { %v862_v6 = vpop.eup %861  ;;  %v506_v7 = vadd.f32 %v505_v4, %v504_v3  ;;  %v503_v8 = vadd.f32 %v502_v5, %v501_v2  ;;  %602 = vmatpush.msra.mxu3 %v575_v16 }
 0x110   : > { %v516_v9 = vmul.f32 %v862_v6, %v854_v38  ;;  %v401_v38 = vpop.f32.mrf.mxu1 }
 0x111   : > { %v507_v10 = vrot.slane %v506_v7, 2  ;;  %863 = vrcp.f32 %v503_v8  ;;  %603 = vmatpush.msra.mxu3 %v574_v27  ;;  %v402_v48 = vadd.f32 %v401_v38, %v350_v42 }
 0x112   : > { %526 = vperm.xlu0 %848, %v516_v9  }
 0x113   : > { %v508_v11 = vadd.f32 %v507_v10, %v506_v7  ;;  %604 = vmatpush.msra.mxu3 %v573_v28  ;;  %v381_v58 = vpop.f32.mrf.mxu0 }
 0x114   : > { %v382_v62 = vadd.f32 %v381_v58, %v349_v32 }
 0x115   : > { %v509_v12 = vrot.slane %v508_v11, 1  ;;  %605 = vmatpush.msra.mxu3 %v572_v29 }
 0x117   : > { %v864_v13 = vpop.eup %863  ;;  %v510_v14 = vadd.f32 %v509_v12, %v508_v11  ;;  %606 = vmatpush.msra.mxu3 %v571_v30 }
 0x118   : > { %v517_v15 = vmul.f32 %v864_v13, %v856_v52  ;;  %v404_v50 = vpop.f32.mrf.mxu1  ;;  %v379_v52 = vadd.f32 %v378_v44, %v349_v32 }
 0x119   : > { %865 = vrcp.f32 %v510_v14  ;;  %v405_v35 = vadd.f32 %v404_v50, %v350_v42 }
 0x11a   : > { %531 = vperm.xlu1 %849, %v517_v15  }
 0x11f   : > { %v866_v20 = vpop.eup %865 }
 0x120   : > { %v518_v21 = vmul.f32 %v866_v20, %v860_v1  ;;  %v407_v0 = vpop.f32.mrf.mxu1 }
 0x121   : > { %v408_v6 = vadd.f32 %v407_v0, %v350_v42 }
 0x122   : > { %536 = vperm.xlu1 %849, %v518_v21  }
 0x128   : > { %v410_v12 = vpop.f32.mrf.mxu1 }
 0x129   : > { %v411_v14 = vadd.f32 %v410_v12, %v350_v42 }
 0x17c   : > { %v522_v36 = vpop.permute.xlu0 %521 }
 0x17d   : > { %v539_v37 = vmul.f32 %v522_v36, %v373_v33 }
 0x17f   : > { %v543_v39 = vrot.slane %v539_v37, 4 }
 0x181   : > { %v544_v40 = vadd.f32 %v543_v39, %v539_v37 }
 0x183   : > { %v545_v41 = vrot.slane %v544_v40, 2 }
 0x184   : > { %v527_v43 = vpop.permute.xlu0 %526 }
 0x185   : > { %v546_v45 = vadd.f32 %v545_v41, %v544_v40  ;;  %v540_v46 = vmul.f32 %v527_v43, %v376_v17 }
 0x187   : > { %v549_v47 = vrot.slane %v540_v46, 4  ;;  %v547_v49 = vrot.slane %v546_v45, 1 }
 0x189   : > { %v550_v51 = vadd.f32 %v549_v47, %v540_v46  ;;  %v548_v53 = vadd.f32 %v547_v49, %v546_v45 }
 0x18b   : > { %v551_v54 = vrot.slane %v550_v51, 2  ;;  %v567_v18 = vmul.f32 %v548_v53, %v402_v48 }
 0x18c   : > { %v532_v55 = vpop.permute.xlu1 %531 }
 0x18d   : > { %v552_v56 = vadd.f32 %v551_v54, %v550_v51  ;;  %v541_v57 = vmul.f32 %v532_v55, %v379_v52  ;;  %607 = vmatmul.f32.vlgmr.msra.gmra.mxu3 %v567_v18 }
 0x18f   : > { %v555_v59 = vrot.slane %v541_v57, 4  ;;  %v553_v60 = vrot.slane %v552_v56, 1 }
 0x191   : > { %v556_v61 = vadd.f32 %v555_v59, %v541_v57  ;;  %v554_v63 = vadd.f32 %v553_v60, %v552_v56 }
 0x193   : > { %v557_v19 = vrot.slane %v556_v61, 2  ;;  %v568_v1 = vmul.f32 %v554_v63, %v405_v35 }
 0x194   : > { %v537_v2 = vpop.permute.xlu1 %536 }
 0x195   : > { %v558_v3 = vadd.f32 %v557_v19, %v556_v61  ;;  %v542_v4 = vmul.f32 %v537_v2, %v382_v62  ;;  %610 = vmatmul.f32.gmra.mxu3 %v568_v1 }
 0x197   : > { %v561_v5 = vrot.slane %v542_v4, 4  ;;  %v559_v7 = vrot.slane %v558_v3, 1 }
 0x199   : > { %v562_v8 = vadd.f32 %v561_v5, %v542_v4  ;;  %v560_v9 = vadd.f32 %v559_v7, %v558_v3 }
 0x19b   : > { %v563_v10 = vrot.slane %v562_v8, 2  ;;  %v569_v11 = vmul.f32 %v560_v9, %v408_v6 }
 0x19d   : > { %v564_v13 = vadd.f32 %v563_v10, %v562_v8  ;;  %613 = vmatmul.f32.gmra.mxu3 %v569_v11 }
 0x19f   : > { %v565_v15 = vrot.slane %v564_v13, 1 }
 0x1a1   : > { %v566_v20 = vadd.f32 %v565_v15, %v564_v13 }
 0x1a3   : > { %v570_v21 = vmul.f32 %v566_v20, %v411_v14 }
 0x1a5   : > { %616 = vmatmul.f32.gmra.mxu3 %v570_v21 }
 0x210   : > { %v608_v23 = vpop.f32.mrf.mxu3 }
 0x211   : > { %v609_v24 = vadd.f32 %v850_v22, %v608_v23 }
 0x213   : > { %620 = vst [vmem:[%s292_s28] sm:$0xff] %v609_v24 }
 0x218   : > { %v611_v25 = vpop.f32.mrf.mxu3 }
 0x219   : > { %v612_v26 = vadd.f32 %v850_v22, %v611_v25 }
 0x21b   : > { %621 = vst [vmem:[%s292_s28 + $0x8] sm:$0xff] %v612_v26 }
 0x220   : > { %v614_v16 = vpop.f32.mrf.mxu3 }
 0x221   : > { %v615_v27 = vadd.f32 %v850_v22, %v614_v16 }
 0x223   : > { %622 = vst [vmem:[%s292_s28 + $0x10] sm:$0xff] %v615_v27 }
 0x228   : > { %v617_v28 = vpop.f32.mrf.mxu3 }
 0x229   : > { %v618_v29 = vadd.f32 %v850_v22, %v617_v28 }
 0x22b   : > { %623 = vst [vmem:[%s292_s28 + $0x18] sm:$0xff] %v618_v29 }
 0x22c   : > { %1014 = shalt.err (!%p1011_p10)
}
 0x22d   : > { %s1071_s17 = smov 128   ;;  %s1072_s29 = smov 8  }
 0x22e   : > { %778 = dma.vmem_to_hbm [thread:$0]  (%p1188_p3), %s638_s13, 512, %s640_s12, %s625_s14, %s1071_s17, %s1071_s17, %s1072_s29  }
 0x22f PF: > { %s654_s28 = sand.u32 1, %s1049_s18   ;;  %p1333_p12 = scmp.ge.s32.totalorder %s1061_s21, 2 }
 0x230   : > { %s655_s16 = scalar_lea.sflag [#allocation4], %s654_s28 }
 0x231   : > { %p795_p13 = pnand %p1333_p12, %p1138_p6 }
 0x233   : > { %p796_p0 = pneg %p795_p13 }
 0x235   : > { %1044 = dma.done.wait (%p796_p0), %s655_s16, 512  }
 0x236   : > { %1046 = vsyncadd (%p796_p0), %s655_s16, 4294966784  ;;  %p20_p5 = scmp.ge.s32.totalorder %s1175_s30, 4   ;;  %s1334_s18 = smov %s1053_s19 }
 0x237   : > { %s1335_s19 = smov %s1057_s20  ;;  %s1336_s20 = smov %s1184_s9 }
 0x238   : > { %s1337_s21 = smov %s1175_s30  ;;  %22 = sbr.rel (!%p20_p5) target bundleno = 7 (0x7), region = 97 }
 0x23d   :  { %661 = vsyncpa [#allocation3], 1 }
 0x23e   :  { %663 = vsyncpa [#allocation3 + $0x1], 1 }
 0x23f   :  { %664 = vsyncpa [#allocation6], 1 }
 0x240   :  { %665 = vsyncpa [#allocation9], 1 }
 0x241   :  { %666 = vsyncpa [#allocation4], 1 }
 0x242   :  { %668 = vsyncpa [#allocation4 + $0x1], 1 }

</bundles_post_ra>
